<compile_context>
chip_gen: v6e
topology: v6e:2x2x1
jax: 0.10.0
libtpu: 0.0.40
codegen_flags: <defaults>
</compile_context>

<pallas_src>
import jax
import jax.numpy as jnp
from jax.experimental import pallas as pl
from jax.experimental.pallas import tpu as pltpu

INTERNAL_REPR_SIZE = 16
ACTIONS_SIZE = 8
REWARD_SIZE = 4
HIDDEN_SIZE = 128          # matches the PyTorch default and is lane-aligned


def _dyn_kernel(s_ref, a_ref,
                w1s_ref, w1a_ref, b1_ref,
                w2_ref, b2_ref,
                w3s_ref, b3s_ref, w3r_ref, b3r_ref,
                ns_ref, rew_ref):
    # Linear 1 (concat folded in: x@W1 = s@W1[:ISR] + a@W1[ISR:]) + ReLU
    h1 = jnp.dot(s_ref[...], w1s_ref[...], preferred_element_type=jnp.float32)
    h1 = h1 + jnp.dot(a_ref[...], w1a_ref[...], preferred_element_type=jnp.float32)
    h1 = jnp.maximum(h1 + b1_ref[...], 0.0)                            # (TB, H)

    # Linear 2 + ReLU
    h2 = jnp.dot(h1, w2_ref[...], preferred_element_type=jnp.float32) + b2_ref[...]
    h2 = jnp.maximum(h2, 0.0)                                          # (TB, H)

    # Softmax over hidden features (== nn.Softmax() on 1-D input, and dim=1 on 2-D)
    m = jnp.max(h2, axis=-1, keepdims=True)
    e = jnp.exp(h2 - m)
    inv = pl.reciprocal(jnp.sum(e, axis=-1, keepdims=True), approx=True)  # EUP slot
    p = e * inv                                                         # (TB, H)

    # Linear 3 + Tanh, written straight to the two outputs (W3/b3 pre-split)
    ns = jnp.dot(p, w3s_ref[...], preferred_element_type=jnp.float32) + b3s_ref[...]
    rw = jnp.dot(p, w3r_ref[...], preferred_element_type=jnp.float32) + b3r_ref[...]
    ns_ref[...] = jnp.tanh(ns)                                          # (TB, ISR)
    rew_ref[...] = jnp.tanh(rw)                                         # (TB, REW)


def _forward_2d(states, actions, kparams, *, batch_tile=None):
    """states: (B, ISR), actions: (B, ACT) -> (next_state (B, ISR), reward (B, REW))."""
    w1s, w1a, b1, w2, b2, w3s, b3s, w3r, b3r = kparams
    b = states.shape[0]
    isr, act, rew = w1s.shape[0], w1a.shape[0], w3r.shape[1]

    tb = b if (batch_tile is None or batch_tile >= b) else batch_tile
    grid_b = pl.cdiv(b, tb)
    bp = grid_b * tb
    if bp != b:                                    # pad batch to a tile multiple
        states = jnp.pad(states, ((0, bp - b), (0, 0)))
        actions = jnp.pad(actions, ((0, bp - b), (0, 0)))

    def row_spec(d):
        return pl.BlockSpec((tb, d), lambda i: (i, 0))

    def resident_spec(arr):
        # Full-array block + constant index map: DMA'd once, stays resident in VMEM.
        return pl.BlockSpec(arr.shape, lambda i: (0, 0))

    ns, rw = pl.pallas_call(
        _dyn_kernel,
        out_shape=(jax.ShapeDtypeStruct((bp, isr), jnp.float32),
                   jax.ShapeDtypeStruct((bp, rew), jnp.float32)),
        grid=(grid_b,),
        in_specs=[row_spec(isr), row_spec(act),
                  resident_spec(w1s), resident_spec(w1a), resident_spec(b1),
                  resident_spec(w2), resident_spec(b2),
                  resident_spec(w3s), resident_spec(b3s),
                  resident_spec(w3r), resident_spec(b3r)],
        out_specs=(row_spec(isr), row_spec(rew)),
        compiler_params=pltpu.CompilerParams(dimension_semantics=("parallel",)),
    )(states.astype(jnp.float32), actions.astype(jnp.float32),
      w1s, w1a, b1, w2, b2, w3s, b3s, w3r, b3r)

    if bp != b:
        ns, rw = ns[:b], rw[:b]
    return ns, rw


def rl_dynamics_forward(state, action, kparams):
    """Matches RLDynamicsNetwork.forward: state (ISR,), action (ACT,)."""
    ns, rw = _forward_2d(state.reshape(1, -1), action.reshape(1, -1), kparams)
    return ns[0], rw[0]


def rl_dynamics_forward_batch(state, actions, kparams, *, batch_tile=128):
    """Matches RLDynamicsNetwork.forward_batch: one state (ISR,), actions (B, ACT).
    Returns the full model output (B, ISR + REW), like the PyTorch module."""
    b = actions.shape[0]
    states = jnp.broadcast_to(state, (b, state.shape[0]))
    ns, rw = _forward_2d(states, actions, kparams, batch_tile=batch_tile)
    return jnp.concatenate([ns, rw], axis=-1)


# ---------------- deterministic parameter construction (synthetic) ----------------

def init_params(key):
    """PyTorch nn.Linear-style uniform(-1/sqrt(fan_in), +1/sqrt(fan_in)) init.
    Weights are stored transposed vs PyTorch, i.e. (in_features, out_features)."""
    in_dim = INTERNAL_REPR_SIZE + ACTIONS_SIZE
    out_dim = INTERNAL_REPR_SIZE + REWARD_SIZE
    dims = [(in_dim, HIDDEN_SIZE), (HIDDEN_SIZE, HIDDEN_SIZE), (HIDDEN_SIZE, out_dim)]
    params = []
    for fi, fo in dims:
        key, kw, kb = jax.random.split(key, 3)
        bound = 1.0 / jnp.sqrt(jnp.float32(fi))
        params.append(jax.random.uniform(kw, (fi, fo), jnp.float32, -bound, bound))
        params.append(jax.random.uniform(kb, (fo,), jnp.float32, -bound, bound))
    return tuple(params)


def pack_params(params):
    """Split / reshape (in,out)-layout params into the kernel layout:
    W1 split by [state | action] rows, W3/b3 split by [next_state | reward] cols,
    biases as (1, D) rows so they broadcast across the batch tile in VMEM."""
    w1, b1, w2, b2, w3, b3 = params
    isr = INTERNAL_REPR_SIZE
    return (w1[:isr, :], w1[isr:, :], b1.reshape(1, -1),
            w2, b2.reshape(1, -1),
            w3[:, :isr], b3[:isr].reshape(1, -1),
            w3[:, isr:], b3[isr:].reshape(1, -1))


# ---------------- plain-JAX references for correctness checking ----------------

def _reference_forward(state, action, params):
    w1, b1, w2, b2, w3, b3 = params
    x = jnp.concatenate([state, action])
    h1 = jnp.maximum(x @ w1 + b1, 0.0)
    h2 = jnp.maximum(h1 @ w2 + b2, 0.0)
    s = jax.nn.softmax(h2, axis=-1)
    y = jnp.tanh(s @ w3 + b3)
    return y[:INTERNAL_REPR_SIZE], y[-REWARD_SIZE:]


def _reference_forward_batch(state, actions, params):
    w1, b1, w2, b2, w3, b3 = params
    x = jnp.concatenate(
        [jnp.broadcast_to(state, (actions.shape[0], state.shape[0])), actions], axis=1)
    h1 = jnp.maximum(x @ w1 + b1, 0.0)
    h2 = jnp.maximum(h1 @ w2 + b2, 0.0)
    s = jax.nn.softmax(h2, axis=-1)
    return jnp.tanh(s @ w3 + b3)


if __name__ == "__main__":
    key = jax.random.PRNGKey(0)
    kp, ks, ka, kb = jax.random.split(key, 4)

    params = init_params(kp)
    kparams = pack_params(params)

    # Tolerances are relaxed slightly because the softmax denominator uses the
    # hardware approximate reciprocal (EUP); the error is a small relative scale.
    ATOL, RTOL = 1e-3, 1e-2

    # --- single-step forward (RLDynamicsNetwork.forward) ---
    state = jax.random.normal(ks, (INTERNAL_REPR_SIZE,), jnp.float32)
    action = jax.random.normal(ka, (ACTIONS_SIZE,), jnp.float32)
    next_state, reward = rl_dynamics_forward(state, action, kparams)
    jax.block_until_ready((next_state, reward))

    ref_ns, ref_r = _reference_forward(state, action, params)
    assert next_state.shape == (INTERNAL_REPR_SIZE,)
    assert reward.shape == (REWARD_SIZE,)
    assert jnp.allclose(next_state, ref_ns, atol=ATOL, rtol=RTOL)
    assert jnp.allclose(reward, ref_r, atol=ATOL, rtol=RTOL)

    # --- batched forward (RLDynamicsNetwork.forward_batch), tiled 128 rows/grid step ---
    B = 256
    actions = jax.random.normal(kb, (B, ACTIONS_SIZE), jnp.float32)
    out = rl_dynamics_forward_batch(state, actions, kparams, batch_tile=128)
    jax.block_until_ready(out)

    ref_out = _reference_forward_batch(state, actions, params)
    assert out.shape == (B, INTERNAL_REPR_SIZE + REWARD_SIZE)
    assert jnp.allclose(out, ref_out, atol=ATOL, rtol=RTOL)

    print("KERNEL_OK")
</pallas_src>

<mosaic_0001>
module attributes {stable_mosaic.version = 11 : i64} {
  func.func @_dyn_kernel(%arg0: i32, %arg1: memref<1x16xf32, #tpu.memory_space<vmem>>, %arg2: memref<1x8xf32, #tpu.memory_space<vmem>>, %arg3: memref<16x128xf32, #tpu.memory_space<vmem>>, %arg4: memref<8x128xf32, #tpu.memory_space<vmem>>, %arg5: memref<1x128xf32, #tpu.memory_space<vmem>>, %arg6: memref<128x128xf32, #tpu.memory_space<vmem>>, %arg7: memref<1x128xf32, #tpu.memory_space<vmem>>, %arg8: memref<128x16xf32, #tpu.memory_space<vmem>>, %arg9: memref<1x16xf32, #tpu.memory_space<vmem>>, %arg10: memref<128x4xf32, #tpu.memory_space<vmem>>, %arg11: memref<1x4xf32, #tpu.memory_space<vmem>>, %arg12: memref<1x16xf32, #tpu.memory_space<vmem>>, %arg13: memref<1x4xf32, #tpu.memory_space<vmem>>) attributes {dimension_semantics = [#tpu.dimension_semantics<parallel>], iteration_bounds = array<i64: 1>, scalar_prefetch = 0 : i64, scratch_operands = 0 : i64, tpu.core_type = #tpu.core_type<tc>, window_params = [{transform_indices = @transform_0, window_bounds = array<i64: 1, 16>}, {transform_indices = @transform_1, window_bounds = array<i64: 1, 8>}, {pipeline_mode = #tpu.pipeline_mode<synchronous>, transform_indices = @transform_2, window_bounds = array<i64: 16, 128>}, {pipeline_mode = #tpu.pipeline_mode<synchronous>, transform_indices = @transform_3, window_bounds = array<i64: 8, 128>}, {pipeline_mode = #tpu.pipeline_mode<synchronous>, transform_indices = @transform_4, window_bounds = array<i64: 1, 128>}, {pipeline_mode = #tpu.pipeline_mode<synchronous>, transform_indices = @transform_5, window_bounds = array<i64: 128, 128>}, {pipeline_mode = #tpu.pipeline_mode<synchronous>, transform_indices = @transform_6, window_bounds = array<i64: 1, 128>}, {pipeline_mode = #tpu.pipeline_mode<synchronous>, transform_indices = @transform_7, window_bounds = array<i64: 128, 16>}, {pipeline_mode = #tpu.pipeline_mode<synchronous>, transform_indices = @transform_8, window_bounds = array<i64: 1, 16>}, {pipeline_mode = #tpu.pipeline_mode<synchronous>, transform_indices = @transform_9, window_bounds = array<i64: 128, 4>}, {pipeline_mode = #tpu.pipeline_mode<synchronous>, transform_indices = @transform_10, window_bounds = array<i64: 1, 4>}, {transform_indices = @transform_11, window_bounds = array<i64: 1, 16>}, {transform_indices = @transform_12, window_bounds = array<i64: 1, 4>}]} {
    %c0 = arith.constant 0 : index
    %c0_0 = arith.constant 0 : index
    %0 = vector.load %arg1[%c0, %c0_0] : memref<1x16xf32, #tpu.memory_space<vmem>>, vector<1x16xf32>
    %c0_1 = arith.constant 0 : index
    %c0_2 = arith.constant 0 : index
    %1 = vector.load %arg3[%c0_1, %c0_2] : memref<16x128xf32, #tpu.memory_space<vmem>>, vector<16x128xf32>
    %cst = arith.constant dense<0.000000e+00> : vector<1x128xf32>
    %2 = tpu.matmul %0, %1, %cst {dimension_numbers = #tpu.dot_dimension_numbers<[1], [0], [0], [1], [0, 0, 1, 1], [], []>} : vector<1x16xf32>, vector<16x128xf32>, vector<1x128xf32> -> vector<1x128xf32>
    %c0_3 = arith.constant 0 : index
    %c0_4 = arith.constant 0 : index
    %3 = vector.load %arg2[%c0_3, %c0_4] : memref<1x8xf32, #tpu.memory_space<vmem>>, vector<1x8xf32>
    %c0_5 = arith.constant 0 : index
    %c0_6 = arith.constant 0 : index
    %4 = vector.load %arg4[%c0_5, %c0_6] : memref<8x128xf32, #tpu.memory_space<vmem>>, vector<8x128xf32>
    %cst_7 = arith.constant dense<0.000000e+00> : vector<1x128xf32>
    %5 = tpu.matmul %3, %4, %cst_7 {dimension_numbers = #tpu.dot_dimension_numbers<[1], [0], [0], [1], [0, 0, 1, 1], [], []>} : vector<1x8xf32>, vector<8x128xf32>, vector<1x128xf32> -> vector<1x128xf32>
    %6 = arith.addf %2, %5 : vector<1x128xf32>
    %c0_8 = arith.constant 0 : index
    %c0_9 = arith.constant 0 : index
    %7 = vector.load %arg5[%c0_8, %c0_9] : memref<1x128xf32, #tpu.memory_space<vmem>>, vector<1x128xf32>
    %8 = arith.addf %6, %7 : vector<1x128xf32>
    %cst_10 = arith.constant 0.000000e+00 : f32
    %9 = vector.broadcast %cst_10 : f32 to vector<1x128xf32>
    %10 = arith.maximumf %8, %9 : vector<1x128xf32>
    %c0_11 = arith.constant 0 : index
    %c0_12 = arith.constant 0 : index
    %11 = vector.load %arg6[%c0_11, %c0_12] : memref<128x128xf32, #tpu.memory_space<vmem>>, vector<128x128xf32>
    %cst_13 = arith.constant dense<0.000000e+00> : vector<1x128xf32>
    %12 = tpu.matmul %10, %11, %cst_13 {dimension_numbers = #tpu.dot_dimension_numbers<[1], [0], [0], [1], [0, 0, 1, 1], [], []>} : vector<1x128xf32>, vector<128x128xf32>, vector<1x128xf32> -> vector<1x128xf32>
    %c0_14 = arith.constant 0 : index
    %c0_15 = arith.constant 0 : index
    %13 = vector.load %arg7[%c0_14, %c0_15] : memref<1x128xf32, #tpu.memory_space<vmem>>, vector<1x128xf32>
    %14 = arith.addf %12, %13 : vector<1x128xf32>
    %cst_16 = arith.constant 0.000000e+00 : f32
    %15 = vector.broadcast %cst_16 : f32 to vector<1x128xf32>
    %16 = arith.maximumf %14, %15 : vector<1x128xf32>
    %cst_17 = arith.constant dense<0xFF800000> : vector<1xf32>
    %17 = vector.multi_reduction <maximumf>, %16, %cst_17 [1] : vector<1x128xf32> to vector<1xf32>
    %18 = vector.shape_cast %17 : vector<1xf32> to vector<1x1xf32>
    %19 = vector.broadcast %18 : vector<1x1xf32> to vector<1x128xf32>
    %20 = arith.subf %16, %19 : vector<1x128xf32>
    %21 = math.exp %20 : vector<1x128xf32>
    %cst_18 = arith.constant dense<0.000000e+00> : vector<1xf32>
    %22 = vector.multi_reduction <add>, %21, %cst_18 [1] : vector<1x128xf32> to vector<1xf32>
    %23 = vector.shape_cast %22 : vector<1xf32> to vector<1x1xf32>
    %24 = tpu.reciprocal %23 {approx = true} : vector<1x1xf32> -> vector<1x1xf32>
    %25 = vector.broadcast %24 : vector<1x1xf32> to vector<1x128xf32>
    %26 = arith.mulf %21, %25 : vector<1x128xf32>
    %c0_19 = arith.constant 0 : index
    %c0_20 = arith.constant 0 : index
    %27 = vector.load %arg8[%c0_19, %c0_20] : memref<128x16xf32, #tpu.memory_space<vmem>>, vector<128x16xf32>
    %cst_21 = arith.constant dense<0.000000e+00> : vector<1x16xf32>
    %28 = tpu.matmul %26, %27, %cst_21 {dimension_numbers = #tpu.dot_dimension_numbers<[1], [0], [0], [1], [0, 0, 1, 1], [], []>} : vector<1x128xf32>, vector<128x16xf32>, vector<1x16xf32> -> vector<1x16xf32>
    %c0_22 = arith.constant 0 : index
    %c0_23 = arith.constant 0 : index
    %29 = vector.load %arg9[%c0_22, %c0_23] : memref<1x16xf32, #tpu.memory_space<vmem>>, vector<1x16xf32>
    %30 = arith.addf %28, %29 : vector<1x16xf32>
    %c0_24 = arith.constant 0 : index
    %c0_25 = arith.constant 0 : index
    %31 = vector.load %arg10[%c0_24, %c0_25] : memref<128x4xf32, #tpu.memory_space<vmem>>, vector<128x4xf32>
    %cst_26 = arith.constant dense<0.000000e+00> : vector<1x4xf32>
    %32 = tpu.matmul %26, %31, %cst_26 {dimension_numbers = #tpu.dot_dimension_numbers<[1], [0], [0], [1], [0, 0, 1, 1], [], []>} : vector<1x128xf32>, vector<128x4xf32>, vector<1x4xf32> -> vector<1x4xf32>
    %c0_27 = arith.constant 0 : index
    %c0_28 = arith.constant 0 : index
    %33 = vector.load %arg11[%c0_27, %c0_28] : memref<1x4xf32, #tpu.memory_space<vmem>>, vector<1x4xf32>
    %34 = arith.addf %32, %33 : vector<1x4xf32>
    %35 = math.tanh %30 : vector<1x16xf32>
    %c0_29 = arith.constant 0 : index
    %c0_30 = arith.constant 0 : index
    %36 = vector.load %arg12[%c0_29, %c0_30] : memref<1x16xf32, #tpu.memory_space<vmem>>, vector<1x16xf32>
    tpu.vector_store %arg12[%c0_29, %c0_30], %35 {strides = array<i32>} : memref<1x16xf32, #tpu.memory_space<vmem>>, vector<1x16xf32>,
    %37 = math.tanh %34 : vector<1x4xf32>
    %c0_31 = arith.constant 0 : index
    %c0_32 = arith.constant 0 : index
    %38 = vector.load %arg13[%c0_31, %c0_32] : memref<1x4xf32, #tpu.memory_space<vmem>>, vector<1x4xf32>
    tpu.vector_store %arg13[%c0_31, %c0_32], %37 {strides = array<i32>} : memref<1x4xf32, #tpu.memory_space<vmem>>, vector<1x4xf32>,
    return
  }
  func.func @transform_0(%arg0: i32) -> (i32, i32) {
    %c0_i32 = arith.constant 0 : i32
    %c0_i32_0 = arith.constant 0 : i32
    return %arg0, %c0_i32 : i32, i32
  }
  func.func @transform_1(%arg0: i32) -> (i32, i32) {
    %c0_i32 = arith.constant 0 : i32
    %c0_i32_0 = arith.constant 0 : i32
    return %arg0, %c0_i32 : i32, i32
  }
  func.func @transform_2(%arg0: i32) -> (i32, i32) {
    %c0_i32 = arith.constant 0 : i32
    %c0_i32_0 = arith.constant 0 : i32
    %c0_i32_1 = arith.constant 0 : i32
    return %c0_i32, %c0_i32_0 : i32, i32
  }
  func.func @transform_3(%arg0: i32) -> (i32, i32) {
    %c0_i32 = arith.constant 0 : i32
    %c0_i32_0 = arith.constant 0 : i32
    %c0_i32_1 = arith.constant 0 : i32
    return %c0_i32, %c0_i32_0 : i32, i32
  }
  func.func @transform_4(%arg0: i32) -> (i32, i32) {
    %c0_i32 = arith.constant 0 : i32
    %c0_i32_0 = arith.constant 0 : i32
    %c0_i32_1 = arith.constant 0 : i32
    return %c0_i32, %c0_i32_0 : i32, i32
  }
  func.func @transform_5(%arg0: i32) -> (i32, i32) {
    %c0_i32 = arith.constant 0 : i32
    %c0_i32_0 = arith.constant 0 : i32
    %c0_i32_1 = arith.constant 0 : i32
    return %c0_i32, %c0_i32_0 : i32, i32
  }
  func.func @transform_6(%arg0: i32) -> (i32, i32) {
    %c0_i32 = arith.constant 0 : i32
    %c0_i32_0 = arith.constant 0 : i32
    %c0_i32_1 = arith.constant 0 : i32
    return %c0_i32, %c0_i32_0 : i32, i32
  }
  func.func @transform_7(%arg0: i32) -> (i32, i32) {
    %c0_i32 = arith.constant 0 : i32
    %c0_i32_0 = arith.constant 0 : i32
    %c0_i32_1 = arith.constant 0 : i32
    return %c0_i32, %c0_i32_0 : i32, i32
  }
  func.func @transform_8(%arg0: i32) -> (i32, i32) {
    %c0_i32 = arith.constant 0 : i32
    %c0_i32_0 = arith.constant 0 : i32
    %c0_i32_1 = arith.constant 0 : i32
    return %c0_i32, %c0_i32_0 : i32, i32
  }
  func.func @transform_9(%arg0: i32) -> (i32, i32) {
    %c0_i32 = arith.constant 0 : i32
    %c0_i32_0 = arith.constant 0 : i32
    %c0_i32_1 = arith.constant 0 : i32
    return %c0_i32, %c0_i32_0 : i32, i32
  }
  func.func @transform_10(%arg0: i32) -> (i32, i32) {
    %c0_i32 = arith.constant 0 : i32
    %c0_i32_0 = arith.constant 0 : i32
    %c0_i32_1 = arith.constant 0 : i32
    return %c0_i32, %c0_i32_0 : i32, i32
  }
  func.func @transform_11(%arg0: i32) -> (i32, i32) {
    %c0_i32 = arith.constant 0 : i32
    %c0_i32_0 = arith.constant 0 : i32
    return %arg0, %c0_i32 : i32, i32
  }
  func.func @transform_12(%arg0: i32) -> (i32, i32) {
    %c0_i32 = arith.constant 0 : i32
    %c0_i32_0 = arith.constant 0 : i32
    return %arg0, %c0_i32 : i32, i32
  }
}

</mosaic_0001>

<bundles_post_ra>
// kernel: tpu_custom_call.1
= control target key start
LH: loop header
LB: loop body
LE: loop exit
PB: predicated region body
PF: predicated region fallthrough
CT: control target
= control target key end

     0   :  { %18 = vsyncpa [#allocation3], 0  ;;  %vm47_vm0 = vcmask 64512   ;;  %v737_v2 = vmov 0.0   ;;  %vm738_vm1 = vmmov 0   ;;  %vm121_vm2 = vcmask 130048   ;;  %s1046_s0 = inlined_call_operand.vmem [shape: f32[1,16], index: 0, kind: input, shape index: {}]   ;;  %s1047_s1 = inlined_call_operand.vmem [shape: f32[1,8], index: 1, kind: input, shape index: {}]   ;;  %s1048_s2 = inlined_call_operand.vmem [shape: f32[16,128], index: 2, kind: input, shape index: {}]   ;;  %s1049_s3 = inlined_call_operand.vmem [shape: f32[8,128], index: 3, kind: input, shape index: {}]   ;;  %s1050_s4 = inlined_call_operand.vmem [shape: f32[1,128], index: 4, kind: input, shape index: {}]   ;;  %s1051_s5 = inlined_call_operand.vmem [shape: f32[128,128], index: 5, kind: input, shape index: {}]   ;;  %s1052_s6 = inlined_call_operand.vmem [shape: f32[1,128], index: 6, kind: input, shape index: {}]   ;;  %s1053_s7 = inlined_call_operand.vmem [shape: f32[128,16], index: 7, kind: input, shape index: {}]   ;;  %s1054_s8 = inlined_call_operand.vmem [shape: f32[1,16], index: 8, kind: input, shape index: {}]   ;;  %s1055_s9 = inlined_call_operand.vmem [shape: f32[128,4], index: 9, kind: input, shape index: {}]   ;;  %s1056_s10 = inlined_call_operand.vmem [shape: f32[1,4], index: 10, kind: input, shape index: {}]   ;;  %s1057_s11 = inlined_call_operand.hbm [shape: f32[1,16], index: 11, kind: output, shape index: {0}]   ;;  %s1058_s12 = inlined_call_operand.hbm [shape: f32[1,4], index: 12, kind: output, shape index: {1}]  }
   0x1   :  { %v46_v0 = vld [vmem:[%s1049_s3] sm:$0xff]  ;;  %564 = vmatprep.subr.mxu1 %v737_v2  ;;  %566 = vmatprep.mubr.msk.f32.mxu1 %vm738_vm1, %v737_v2  ;;  %v44_v3 = vld [vmem:[%s1048_s2 + $0x8] sm:$0xff]  ;;  %v213_v4 = vld [vmem:[%s1051_s5 + $0x78] sm:$0xff] }
   0x2   :  { %v45_v1 = vld [vmem:[%s1047_s1] sm:$0x1]  ;;  %565 = vmatpush3.msra.mxu1 %v46_v0  ;;  %576 = vmatprep.subr.mxu0 %v737_v2  ;;  %v212_v7 = vld [vmem:[%s1051_s5 + $0x70] sm:$0xff] }
   0x3   :  { %567 = vmatmul.mubr.msk.f32.vlgmr.msra.gmra.mxu1 %vm47_vm0, %v45_v1  ;;  %569 = vmatprep.subr.mxu1 %v737_v2  ;;  %v43_v5 = vld [vmem:[%s1048_s2] sm:$0xff] }
   0x4   :  { %570 = vmatpush3.msra.mxu1 %v44_v3  ;;  %573 = vmatprep.mubr.msk.f32.mxu1 %vm738_vm1, %v737_v2  ;;  %v42_v6 = vld [vmem:[%s1046_s0] sm:$0x1] }
   0x5   :  { %571 = vmatprep.subr.mxu1 %v737_v2  ;;  %577 = vmatpush3.msra.mxu0 %v213_v4 }
   0x6   :  { %19 = vsyncpa [#allocation5], 0  ;;  %572 = vmatpush3.msra.mxu1 %v43_v5  ;;  %578 = vmatprep.subr.mxu0 %v737_v2  ;;  %v211_v8 = vld [vmem:[%s1051_s5 + $0x68] sm:$0xff]  ;;  %v210_v9 = vld [vmem:[%s1051_s5 + $0x60] sm:$0xff]  ;;  %vm286_vm3 = vcmask 1040384   ;;  %s739_s15 = smov [#allocation2]  }
   0x7   :  { %574 = vmatmul.mubr.msk.f32.vlgmr.msra.gmra.mxu1 %vm121_vm2, %v42_v6  ;;  %579 = vmatpush3.msra.mxu0 %v212_v7  ;;  %v209_v10 = vld [vmem:[%s1051_s5 + $0x58] sm:$0xff]  ;;  %v208_v11 = vld [vmem:[%s1051_s5 + $0x50] sm:$0xff]  ;;  %v207_v12 = vld [vmem:[%s1051_s5 + $0x48] sm:$0xff]  ;;  %s484_s0 = sshll.u32 %s739_s15, 4  ;;  %s740_s16 = smov [#allocation4]   ;;  %vm473_vm4 = vcmask 122880   ;;  %s485_s0 = int_to_ptr.vmem [resolvable:$true] %s484_s0 }
   0x8   :  { %580 = vmatprep.subr.mxu0 %v737_v2  ;;  %608 = vmatprep.mubr.msk.f32.mxu0 %vm738_vm1, %v737_v2  ;;  %v206_v13 = vld [vmem:[%s1051_s5 + $0x40] sm:$0xff]  ;;  %v205_v14 = vld [vmem:[%s1051_s5 + $0x38] sm:$0xff]  ;;  %v204_v15 = vld [vmem:[%s1051_s5 + $0x30] sm:$0xff]  ;;  %s494_s17 = sshll.u32 %s740_s16, 4  ;;  %vm476_vm5 = vcmask 24576   ;;  %p698_p1 = scmp.lt.s32.totalorder %s485_s0, %s485_s0  ;;  %s495_s17 = int_to_ptr.vmem [resolvable:$true] %s494_s17 }
   0x9   :  { %581 = vmatpush3.msra.mxu0 %v211_v8  ;;  %611 = vmatprep.subr.mxu1 %v737_v2  ;;  %v203_v16 = vld [vmem:[%s1051_s5 + $0x28] sm:$0xff]  ;;  %v202_v17 = vld [vmem:[%s1051_s5 + $0x20] sm:$0xff]  ;;  %v201_v18 = vld [vmem:[%s1051_s5 + $0x18] sm:$0xff] }
   0xa   :  { %582 = vmatprep.subr.mxu0 %v737_v2  ;;  %643 = vmatprep.mubr.msk.f32.mxu1 %vm738_vm1, %v737_v2  ;;  %v200_v19 = vld [vmem:[%s1051_s5 + $0x10] sm:$0xff]  ;;  %v199_v20 = vld [vmem:[%s1051_s5 + $0x8] sm:$0xff]  ;;  %v198_v21 = vld [vmem:[%s1051_s5] sm:$0xff] }
   0xb   :  { %583 = vmatpush3.msra.mxu0 %v210_v9  ;;  %v195_v25 = vld [vmem:[%s1050_s4] sm:$0x1]  ;;  %v313_v36 = vld [vmem:[%s1053_s7 + $0x78] sm:$0xff]  ;;  %v312_v38 = vld [vmem:[%s1053_s7 + $0x70] sm:$0xff] }
   0xc   :  { %584 = vmatprep.subr.mxu0 %v737_v2  ;;  %v214_v30 = vld [vmem:[%s1052_s6] sm:$0x1]  ;;  %v400_v37 = vld [vmem:[%s1055_s9 + $0x78] sm:$0xff]  ;;  %612 = vmatpush3.msra.mxu1 %v313_v36  ;;  %v399_v39 = vld [vmem:[%s1055_s9 + $0x70] sm:$0xff] }
   0xd   :  { %585 = vmatpush3.msra.mxu0 %v209_v10  ;;  %613 = vmatprep.subr.mxu1 %v737_v2  ;;  %v311_v40 = vld [vmem:[%s1053_s7 + $0x68] sm:$0xff]  ;;  %v310_v42 = vld [vmem:[%s1053_s7 + $0x60] sm:$0xff]  ;;  %v309_v44 = vld [vmem:[%s1053_s7 + $0x58] sm:$0xff] }
   0xe   :  { %586 = vmatprep.subr.mxu0 %v737_v2  ;;  %v398_v41 = vld [vmem:[%s1055_s9 + $0x68] sm:$0xff]  ;;  %614 = vmatpush3.msra.mxu1 %v312_v38  ;;  %v397_v43 = vld [vmem:[%s1055_s9 + $0x60] sm:$0xff]  ;;  %v396_v45 = vld [vmem:[%s1055_s9 + $0x58] sm:$0xff] }
   0xf   :  { %587 = vmatpush3.msra.mxu0 %v208_v11  ;;  %615 = vmatprep.subr.mxu1 %v737_v2  ;;  %v308_v46 = vld [vmem:[%s1053_s7 + $0x50] sm:$0xff]  ;;  %v307_v48 = vld [vmem:[%s1053_s7 + $0x48] sm:$0xff]  ;;  %v306_v50 = vld [vmem:[%s1053_s7 + $0x40] sm:$0xff] }
  0x10   :  { %588 = vmatprep.subr.mxu0 %v737_v2  ;;  %616 = vmatpush3.msra.mxu1 %v311_v40  ;;  %v395_v47 = vld [vmem:[%s1055_s9 + $0x50] sm:$0xff]  ;;  %v394_v49 = vld [vmem:[%s1055_s9 + $0x48] sm:$0xff]  ;;  %v393_v51 = vld [vmem:[%s1055_s9 + $0x40] sm:$0xff] }
  0x11   :  { %589 = vmatpush3.msra.mxu0 %v207_v12  ;;  %617 = vmatprep.subr.mxu1 %v737_v2  ;;  %v305_v57 = vld [vmem:[%s1053_s7 + $0x38] sm:$0xff]  ;;  %v304_v59 = vld [vmem:[%s1053_s7 + $0x30] sm:$0xff]  ;;  %v303_v61 = vld [vmem:[%s1053_s7 + $0x28] sm:$0xff] }
  0x12   :  { %590 = vmatprep.subr.mxu0 %v737_v2  ;;  %618 = vmatpush3.msra.mxu1 %v310_v42  ;;  %v392_v58 = vld [vmem:[%s1055_s9 + $0x38] sm:$0xff]  ;;  %v391_v60 = vld [vmem:[%s1055_s9 + $0x30] sm:$0xff]  ;;  %v390_v62 = vld [vmem:[%s1055_s9 + $0x28] sm:$0xff] }
  0x13   :  { %591 = vmatpush3.msra.mxu0 %v206_v13  ;;  %619 = vmatprep.subr.mxu1 %v737_v2  ;;  %v302_v63 = vld [vmem:[%s1053_s7 + $0x20] sm:$0xff]  ;;  %v301_v1 = vld [vmem:[%s1053_s7 + $0x18] sm:$0xff]  ;;  %v300_v4 = vld [vmem:[%s1053_s7 + $0x10] sm:$0xff] }
  0x14   :  { %592 = vmatprep.subr.mxu0 %v737_v2  ;;  %620 = vmatpush3.msra.mxu1 %v309_v44  ;;  %v389_v0 = vld [vmem:[%s1055_s9 + $0x20] sm:$0xff]  ;;  %v388_v3 = vld [vmem:[%s1055_s9 + $0x18] sm:$0xff]  ;;  %v387_v5 = vld [vmem:[%s1055_s9 + $0x10] sm:$0xff] }
  0x15   :  { %593 = vmatpush3.msra.mxu0 %v205_v14  ;;  %621 = vmatprep.subr.mxu1 %v737_v2  ;;  %v299_v6 = vld [vmem:[%s1053_s7 + $0x8] sm:$0xff]  ;;  %v298_v8 = vld [vmem:[%s1053_s7] sm:$0xff] }
  0x16   :  { %594 = vmatprep.subr.mxu0 %v737_v2  ;;  %622 = vmatpush3.msra.mxu1 %v308_v46  ;;  %v386_v7 = vld [vmem:[%s1055_s9 + $0x8] sm:$0xff]  ;;  %v385_v9 = vld [vmem:[%s1055_s9] sm:$0xff] }
  0x17   :  { %595 = vmatpush3.msra.mxu0 %v204_v15  ;;  %623 = vmatprep.subr.mxu1 %v737_v2  ;;  %v314_v13 = vld [vmem:[%s1054_s8] sm:$0x1]  ;;  %s693_s8 = scalar_lea.vmem %s485_s0, 16 }
  0x18   :  { %596 = vmatprep.subr.mxu0 %v737_v2  ;;  %624 = vmatpush3.msra.mxu1 %v307_v48  ;;  %v401_v14 = vld [vmem:[%s1056_s10] sm:$0x1]  ;;  %p694_p0 = scmp.ne.s32.totalorder %s485_s0, %s693_s8  ;;  %s697_s10 = scalar_lea.vmem %s485_s0, 32 }
  0x19   :  { %597 = vmatpush3.msra.mxu0 %v203_v16  ;;  %625 = vmatprep.subr.mxu1 %v737_v2  ;;  %p699_p2 = scmp.lt.s32.totalorder %s697_s10, %s693_s8 }
  0x1a   :  { %598 = vmatprep.subr.mxu0 %v737_v2  ;;  %626 = vmatpush3.msra.mxu1 %v306_v50 }
  0x1b   :  { %599 = vmatpush3.msra.mxu0 %v202_v17  ;;  %627 = vmatprep.subr.mxu1 %v737_v2  ;;  %p700_p3 = por %p699_p2, %p698_p1 }
  0x1c   :  { %600 = vmatprep.subr.mxu0 %v737_v2  ;;  %628 = vmatpush3.msra.mxu1 %v305_v57 }
  0x1d   :  { %601 = vmatpush3.msra.mxu0 %v201_v18  ;;  %629 = vmatprep.subr.mxu1 %v737_v2  ;;  %p701_p4 = pnand %p700_p3, %p694_p0 }
  0x1e   :  { %602 = vmatprep.subr.mxu0 %v737_v2  ;;  %630 = vmatpush3.msra.mxu1 %v304_v59 }
  0x1f   :  { %603 = vmatpush3.msra.mxu0 %v200_v19  ;;  %631 = vmatprep.subr.mxu1 %v737_v2 }
  0x20   :  { %604 = vmatprep.subr.mxu0 %v737_v2  ;;  %632 = vmatpush3.msra.mxu1 %v303_v61 }
  0x21   :  { %605 = vmatpush3.msra.mxu0 %v199_v20  ;;  %633 = vmatprep.subr.mxu1 %v737_v2 }
  0x22   :  { %606 = vmatprep.subr.mxu0 %v737_v2  ;;  %634 = vmatpush3.msra.mxu1 %v302_v63 }
  0x23   :  { %607 = vmatpush3.msra.mxu0 %v198_v21  ;;  %635 = vmatprep.subr.mxu1 %v737_v2 }
  0x24   :  { %646 = vmatprep.subr.mxu0 %v737_v2  ;;  %636 = vmatpush3.msra.mxu1 %v301_v1 }
  0x25   :  { %637 = vmatprep.subr.mxu1 %v737_v2 }
  0x26   :  { %638 = vmatpush3.msra.mxu1 %v300_v4 }
  0x27   :  { %639 = vmatprep.subr.mxu1 %v737_v2 }
  0x28   :  { %640 = vmatpush3.msra.mxu1 %v299_v6 }
  0x29   :  { %641 = vmatprep.subr.mxu1 %v737_v2 }
  0x2a   :  { %642 = vmatpush3.msra.mxu1 %v298_v8 }
  0xc3   :  { %v117_v22 = vpop.f32.mrf.mxu1 }
  0xc5   :  { %v568_v23 = vpop.f32.mrf.mxu1 }
  0xc7   :  { %v191_v24 = vpop.f32.mrf.mxu1 }
  0xc8   :  { %v192_v26 = vadd.f32 %v191_v24, %v117_v22 }
  0xc9   :  { %v575_v27 = vpop.f32.mrf.mxu1 }
  0xca   :  { %v196_v28 = vadd.f32 %v195_v25, %v192_v26 }
  0xcc   :  { %v197_v29 = vmax.f32 %v196_v28, 0.0 }
  0xce   :  { %609 = vmatmul.mubr.f32.vlgmr.msra.gmra.mxu0 %v197_v29 }
  0xcf   :  { %678 = vmatprep.mubr.msk.f32.mxu0 %vm738_vm1, %v737_v2  ;;  %647 = vmatpush3.msra.mxu0 %v400_v37 }
  0xd0   :  { %648 = vmatprep.subr.mxu0 %v737_v2 }
  0xd1   :  { %649 = vmatpush3.msra.mxu0 %v399_v39 }
  0xd2   :  { %650 = vmatprep.subr.mxu0 %v737_v2 }
  0xd3   :  { %651 = vmatpush3.msra.mxu0 %v398_v41 }
  0xd4   :  { %652 = vmatprep.subr.mxu0 %v737_v2 }
  0xd5   :  { %653 = vmatpush3.msra.mxu0 %v397_v43 }
  0xd6   :  { %654 = vmatprep.subr.mxu0 %v737_v2 }
  0xd7   :  { %655 = vmatpush3.msra.mxu0 %v396_v45 }
  0xd8   :  { %656 = vmatprep.subr.mxu0 %v737_v2 }
  0xd9   :  { %657 = vmatpush3.msra.mxu0 %v395_v47 }
  0xda   :  { %658 = vmatprep.subr.mxu0 %v737_v2 }
  0xdb   :  { %659 = vmatpush3.msra.mxu0 %v394_v49 }
  0xdc   :  { %660 = vmatprep.subr.mxu0 %v737_v2 }
  0xdd   :  { %661 = vmatpush3.msra.mxu0 %v393_v51 }
  0xde   :  { %662 = vmatprep.subr.mxu0 %v737_v2 }
  0xdf   :  { %663 = vmatpush3.msra.mxu0 %v392_v58 }
  0xe0   :  { %664 = vmatprep.subr.mxu0 %v737_v2 }
  0xe1   :  { %665 = vmatpush3.msra.mxu0 %v391_v60 }
  0xe2   :  { %666 = vmatprep.subr.mxu0 %v737_v2 }
  0xe3   :  { %667 = vmatpush3.msra.mxu0 %v390_v62 }
  0xe4   :  { %668 = vmatprep.subr.mxu0 %v737_v2 }
  0xe5   :  { %669 = vmatpush3.msra.mxu0 %v389_v0 }
  0xe6   :  { %670 = vmatprep.subr.mxu0 %v737_v2 }
  0xe7   :  { %671 = vmatpush3.msra.mxu0 %v388_v3 }
  0xe8   :  { %672 = vmatprep.subr.mxu0 %v737_v2 }
  0xe9   :  { %673 = vmatpush3.msra.mxu0 %v387_v5 }
  0xea   :  { %674 = vmatprep.subr.mxu0 %v737_v2 }
  0xeb   :  { %675 = vmatpush3.msra.mxu0 %v386_v7 }
  0xec   :  { %676 = vmatprep.subr.mxu0 %v737_v2 }
  0xed   :  { %677 = vmatpush3.msra.mxu0 %v385_v9 }
 0x18e   :  { %v281_v31 = vpop.f32.mrf.mxu0 }
 0x18f   :  { %v282_v32 = vadd.f32 %v281_v31, %v214_v30 }
 0x190   :  { %v610_v33 = vpop.f32.mrf.mxu0 }
 0x191   :  { %v285_v34 = vmax.f32 %v282_v32, 0.0 }
 0x193   :  { %v287_v35 = vsel %vm286_vm3, %v285_v34, -inf }
 0x194   :  { %288 = vmax.xlane.f32.xlu0 %v287_v35 }
 0x21d   :  { %v289_v52 = vpop.xlane.xlu0 %288 }
 0x21e   :  { %v290_v53 = vsub.f32 %v285_v34, %v289_v52 }
 0x220   :  { %v291_v54 = vmul.f32 1.442695, %v290_v53 }
 0x222   :  { %685 = vpow2.f32 %v291_v54 }
 0x22f   :  { %v686_v55 = vpop.eup %685 }
 0x230   :  { %v293_v56 = vsel %vm286_vm3, %v686_v55, 0.0 }
 0x231   :  { %294 = vadd.xlane.f32.xlu0 %v293_v56 }
 0x2ba   :  { %v295_v10 = vpop.xlane.xlu0 %294 }
 0x2bb   :  { %687 = vrcp.f32 %v295_v10 }
 0x2c8   :  { %v688_v11 = vpop.eup %687 }
 0x2c9   :  { %v297_v12 = vmul.f32 %v688_v11, %v686_v55 }
 0x2cb   :  { %644 = vmatmul.mubr.f32.vlgmr.msra.gmra.mxu1 %v297_v12  ;;  %679 = vmatmul.mubr.f32.vlgmr.msra.gmra.mxu0 %v297_v12 }
 0x38b   :  { %v381_v15 = vpop.f32.mrf.mxu1  ;;  %v468_v16 = vpop.f32.mrf.mxu0 }
 0x38c   :  { %v382_v17 = vadd.f32 %v381_v15, %v314_v13  ;;  %v469_v2 = vadd.f32 %v468_v16, %v401_v14 }
 0x38d   :  { %v645_v18 = vpop.f32.mrf.mxu1  ;;  %v680_v19 = vpop.f32.mrf.mxu0 }
 0x38e   :  { %689 = vtanh.f32 %v382_v17 }
 0x38f   :  { %691 = vtanh.f32 %v469_v2 }
 0x39b   :  { %v690_v20 = vpop.eup %689 }
 0x39c   :  { %v692_v21 = vpop.eup %691  ;;  %474 = vst.msk [vmem:[#allocation2] sm:$0x1] %vm473_vm4, %v690_v20 }
 0x39d   :  { %704 = shalt.err (!%p701_p4)
}
 0x39e   :  { %487 = dma.vmem_to_hbm [thread:$0]  %s485_s0, 16, %s1057_s11, [#allocation3]   ;;  %477 = vst.msk [vmem:[#allocation4] sm:$0x1] %vm476_vm5, %v692_v21 }
 0x39f   :  { %s713_s20 = scalar_lea.vmem %s495_s17, 16  ;;  %s717_s21 = scalar_lea.vmem %s495_s17, 32 }
 0x3a0   :  { %p714_p5 = scmp.ne.s32.totalorder %s495_s17, %s713_s20  ;;  %p718_p6 = scmp.lt.s32.totalorder %s495_s17, %s495_s17 }
 0x3a1   :  { %p719_p7 = scmp.lt.s32.totalorder %s717_s21, %s713_s20 }
 0x3a3   :  { %p720_p8 = por %p719_p7, %p718_p6 }
 0x3a5   :  { %p721_p9 = pnand %p720_p8, %p714_p5 }
 0x3a7   :  { %724 = shalt.err (!%p721_p9)
}
 0x3a8   :  { %497 = dma.vmem_to_hbm [thread:$0]  %s495_s17, 16, %s1058_s12, [#allocation5]  }
 0x3a9   :  { %733 = dma.done.wait [#allocation3], 16  }
 0x3aa   :  { %734 = vsyncadd [#allocation3], 4294967280 }
 0x3ab   :  { %735 = dma.done.wait [#allocation5], 16  }
 0x3ac   :  { %736 = vsyncadd [#allocation5], 4294967280 }
 0x3ad   :  { %504 = vsyncpa [#allocation3], 1 }
 0x3ae   :  { %505 = vsyncpa [#allocation5], 1 }

</bundles_post_ra>
